<compile_context>
chip_gen: v6e
topology: v6e:2x2x1
jax: 0.10.0
libtpu: 0.0.40
codegen_flags: <defaults>
</compile_context>

<pallas_src>
import jax
import jax.numpy as jnp
from jax.experimental import pallas as pl
from jax.experimental.pallas import tpu as pltpu

LANE = 128


def dqn_kernel(x_ref, w1_ref, w2_ref, w3_ref, b_ref, o_ref):
    hdim = w1_ref.shape[1]        # 128
    odim = w3_ref.shape[1]        # n_actions padded to a multiple of 128

    # bf16 operands on the MXU, f32 accumulation.
    x = x_ref[...].astype(jnp.bfloat16)

    h1 = jnp.dot(x, w1_ref[...], preferred_element_type=jnp.float32)
    h1 = jnp.maximum(h1 + b_ref[0:1, :hdim], 0.0)          # bias+ReLU in f32

    h2 = jnp.dot(h1.astype(jnp.bfloat16), w2_ref[...],
                 preferred_element_type=jnp.float32)
    h2 = jnp.maximum(h2 + b_ref[1:2, :hdim], 0.0)

    out = jnp.dot(h2.astype(jnp.bfloat16), w3_ref[...],
                  preferred_element_type=jnp.float32)
    o_ref[...] = (out + b_ref[2:3, :odim]).astype(o_ref.dtype)


def dqn_forward(x, params, n_actions, *, tb=128):
    """x: (B, n_observations) f32. params: output of prepare_params."""
    w1, w2, w3, b_all = params
    n_obs = x.shape[1]
    n_act_pad = w3.shape[1]
    B = x.shape[0]

    b_pad = tb * pl.cdiv(B, tb)
    if b_pad != B:
        x = jnp.pad(x, ((0, b_pad - B), (0, 0)))

    out = pl.pallas_call(
        dqn_kernel,
        out_shape=jax.ShapeDtypeStruct((b_pad, n_act_pad), jnp.float32),
        grid=(b_pad // tb,),
        in_specs=[
            pl.BlockSpec((tb, n_obs), lambda i: (i, 0)),       # x tile per step
            pl.BlockSpec(w1.shape, lambda i: (0, 0)),          # VMEM-resident
            pl.BlockSpec(w2.shape, lambda i: (0, 0)),
            pl.BlockSpec(w3.shape, lambda i: (0, 0)),
            pl.BlockSpec(b_all.shape, lambda i: (0, 0)),
        ],
        out_specs=pl.BlockSpec((tb, n_act_pad), lambda i: (i, 0)),
        compiler_params=pltpu.CompilerParams(
            dimension_semantics=("parallel",)),
    )(x, w1, w2, w3, b_all)

    return out[:B, :n_actions]


def init_params(key, n_observations, n_actions, hidden=128):
    # Deterministic init mimicking nn.Linear's uniform(-1/sqrt(fan_in), ...).
    # Weights stored as [in, out] (transposed vs PyTorch's [out, in]).
    ks = jax.random.split(key, 6)

    def linear(kw, kb, fan_in, fan_out):
        bound = 1.0 / jnp.sqrt(jnp.float32(fan_in))
        w = jax.random.uniform(kw, (fan_in, fan_out), jnp.float32, -bound, bound)
        b = jax.random.uniform(kb, (1, fan_out), jnp.float32, -bound, bound)
        return w, b

    w1, b1 = linear(ks[0], ks[1], n_observations, hidden)
    w2, b2 = linear(ks[2], ks[3], hidden, hidden)
    w3, b3 = linear(ks[4], ks[5], hidden, n_actions)
    return (w1, b1, w2, b2, w3, b3)


def prepare_params(raw_params):
    """One-time prep: bf16 weights, lane-dense-padded fc3, fused f32 bias array."""
    w1, b1, w2, b2, w3, b3 = raw_params
    hidden = w1.shape[1]
    n_act = w3.shape[1]
    n_act_pad = LANE * pl.cdiv(n_act, LANE)

    w3p = jnp.pad(w3, ((0, 0), (0, n_act_pad - n_act)))   # zero-padded cols
    b3p = jnp.pad(b3, ((0, 0), (0, n_act_pad - n_act)))

    width = max(hidden, n_act_pad)
    pad_row = lambda b: jnp.pad(b, ((0, 0), (0, width - b.shape[1])))
    b_all = jnp.concatenate([pad_row(b1), pad_row(b2), pad_row(b3p)], axis=0)

    return (w1.astype(jnp.bfloat16),
            w2.astype(jnp.bfloat16),
            w3p.astype(jnp.bfloat16),
            b_all.astype(jnp.float32))


def dqn_reference(x, raw_params):
    # Matches kernel numerics: bf16 matmul operands, f32 accumulate, f32 bias/ReLU.
    w1, b1, w2, b2, w3, b3 = raw_params
    bf = jnp.bfloat16
    h1 = jnp.maximum(
        jnp.dot(x.astype(bf), w1.astype(bf),
                preferred_element_type=jnp.float32) + b1, 0.0)
    h2 = jnp.maximum(
        jnp.dot(h1.astype(bf), w2.astype(bf),
                preferred_element_type=jnp.float32) + b2, 0.0)
    return jnp.dot(h2.astype(bf), w3.astype(bf),
                   preferred_element_type=jnp.float32) + b3


if __name__ == "__main__":
    key = jax.random.PRNGKey(0)
    k_param, k_x1, k_x2 = jax.random.split(key, 3)

    n_observations = 4   # e.g. CartPole observation dim
    n_actions = 2        # e.g. CartPole action dim

    raw_params = init_params(k_param, n_observations, n_actions)
    params = prepare_params(raw_params)

    # Small per-step inference batch (pads to one 128-row tile).
    x_small = jax.random.normal(k_x1, (8, n_observations), jnp.float32)
    out_small = jax.block_until_ready(dqn_forward(x_small, params, n_actions))
    ref_small = dqn_reference(x_small, raw_params)
    assert out_small.shape == (8, n_actions)
    assert jnp.allclose(out_small, ref_small, atol=1e-2, rtol=1e-2), \
        "mismatch vs reference (small batch)"

    # Replay-buffer-sized batch: exercises the multi-tile parallel grid path.
    x_big = jax.random.normal(k_x2, (256, n_observations), jnp.float32)
    out_big = jax.block_until_ready(dqn_forward(x_big, params, n_actions))
    ref_big = dqn_reference(x_big, raw_params)
    assert out_big.shape == (256, n_actions)
    assert jnp.allclose(out_big, ref_big, atol=1e-2, rtol=1e-2), \
        "mismatch vs reference (large batch)"

    print("KERNEL_OK")
</pallas_src>

<mosaic_0001>
module attributes {stable_mosaic.version = 11 : i64} {
  func.func @dqn_kernel(%arg0: i32, %arg1: memref<128x4xf32, #tpu.memory_space<vmem>>, %arg2: memref<4x128xbf16, #tpu.memory_space<vmem>>, %arg3: memref<128x128xbf16, #tpu.memory_space<vmem>>, %arg4: memref<128x128xbf16, #tpu.memory_space<vmem>>, %arg5: memref<3x128xf32, #tpu.memory_space<vmem>>, %arg6: memref<128x128xf32, #tpu.memory_space<vmem>>) attributes {dimension_semantics = [#tpu.dimension_semantics<parallel>], iteration_bounds = array<i64: 1>, scalar_prefetch = 0 : i64, scratch_operands = 0 : i64, tpu.core_type = #tpu.core_type<tc>, window_params = [{transform_indices = @transform_0, window_bounds = array<i64: 128, 4>}, {pipeline_mode = #tpu.pipeline_mode<synchronous>, transform_indices = @transform_1, window_bounds = array<i64: 4, 128>}, {pipeline_mode = #tpu.pipeline_mode<synchronous>, transform_indices = @transform_2, window_bounds = array<i64: 128, 128>}, {pipeline_mode = #tpu.pipeline_mode<synchronous>, transform_indices = @transform_3, window_bounds = array<i64: 128, 128>}, {pipeline_mode = #tpu.pipeline_mode<synchronous>, transform_indices = @transform_4, window_bounds = array<i64: 3, 128>}, {transform_indices = @transform_5, window_bounds = array<i64: 128, 128>}]} {
    %c0 = arith.constant 0 : index
    %c0_0 = arith.constant 0 : index
    %0 = vector.load %arg1[%c0, %c0_0] : memref<128x4xf32, #tpu.memory_space<vmem>>, vector<128x4xf32>
    %1 = arith.truncf %0 : vector<128x4xf32> to vector<128x4xbf16>
    %c0_1 = arith.constant 0 : index
    %c0_2 = arith.constant 0 : index
    %2 = vector.load %arg2[%c0_1, %c0_2] : memref<4x128xbf16, #tpu.memory_space<vmem>>, vector<4x128xbf16>
    %cst = arith.constant dense<0.000000e+00> : vector<128x128xf32>
    %3 = tpu.matmul %1, %2, %cst {dimension_numbers = #tpu.dot_dimension_numbers<[1], [0], [0], [1], [0, 0, 1, 1], [], []>} : vector<128x4xbf16>, vector<4x128xbf16>, vector<128x128xf32> -> vector<128x128xf32>
    %c0_3 = arith.constant 0 : index
    %c0_4 = arith.constant 0 : index
    %4 = vector.load %arg5[%c0_3, %c0_4] : memref<3x128xf32, #tpu.memory_space<vmem>>, vector<1x128xf32>
    %5 = vector.broadcast %4 : vector<1x128xf32> to vector<128x128xf32>
    %6 = arith.addf %3, %5 : vector<128x128xf32>
    %cst_5 = arith.constant 0.000000e+00 : f32
    %7 = vector.broadcast %cst_5 : f32 to vector<128x128xf32>
    %8 = arith.maximumf %6, %7 : vector<128x128xf32>
    %9 = arith.truncf %8 : vector<128x128xf32> to vector<128x128xbf16>
    %c0_6 = arith.constant 0 : index
    %c0_7 = arith.constant 0 : index
    %10 = vector.load %arg3[%c0_6, %c0_7] : memref<128x128xbf16, #tpu.memory_space<vmem>>, vector<128x128xbf16>
    %cst_8 = arith.constant dense<0.000000e+00> : vector<128x128xf32>
    %11 = tpu.matmul %9, %10, %cst_8 {dimension_numbers = #tpu.dot_dimension_numbers<[1], [0], [0], [1], [0, 0, 1, 1], [], []>} : vector<128x128xbf16>, vector<128x128xbf16>, vector<128x128xf32> -> vector<128x128xf32>
    %c1 = arith.constant 1 : index
    %c0_9 = arith.constant 0 : index
    %12 = vector.load %arg5[%c1, %c0_9] : memref<3x128xf32, #tpu.memory_space<vmem>>, vector<1x128xf32>
    %13 = vector.broadcast %12 : vector<1x128xf32> to vector<128x128xf32>
    %14 = arith.addf %11, %13 : vector<128x128xf32>
    %cst_10 = arith.constant 0.000000e+00 : f32
    %15 = vector.broadcast %cst_10 : f32 to vector<128x128xf32>
    %16 = arith.maximumf %14, %15 : vector<128x128xf32>
    %17 = arith.truncf %16 : vector<128x128xf32> to vector<128x128xbf16>
    %c0_11 = arith.constant 0 : index
    %c0_12 = arith.constant 0 : index
    %18 = vector.load %arg4[%c0_11, %c0_12] : memref<128x128xbf16, #tpu.memory_space<vmem>>, vector<128x128xbf16>
    %cst_13 = arith.constant dense<0.000000e+00> : vector<128x128xf32>
    %19 = tpu.matmul %17, %18, %cst_13 {dimension_numbers = #tpu.dot_dimension_numbers<[1], [0], [0], [1], [0, 0, 1, 1], [], []>} : vector<128x128xbf16>, vector<128x128xbf16>, vector<128x128xf32> -> vector<128x128xf32>
    %c2 = arith.constant 2 : index
    %c0_14 = arith.constant 0 : index
    %20 = vector.load %arg5[%c2, %c0_14] : memref<3x128xf32, #tpu.memory_space<vmem>>, vector<1x128xf32>
    %21 = vector.broadcast %20 : vector<1x128xf32> to vector<128x128xf32>
    %22 = arith.addf %19, %21 : vector<128x128xf32>
    %c0_15 = arith.constant 0 : index
    %c0_16 = arith.constant 0 : index
    %23 = vector.load %arg6[%c0_15, %c0_16] : memref<128x128xf32, #tpu.memory_space<vmem>>, vector<128x128xf32>
    tpu.vector_store %arg6[%c0_15, %c0_16], %22 {strides = array<i32>} : memref<128x128xf32, #tpu.memory_space<vmem>>, vector<128x128xf32>,
    return
  }
  func.func @transform_0(%arg0: i32) -> (i32, i32) {
    %c0_i32 = arith.constant 0 : i32
    %c0_i32_0 = arith.constant 0 : i32
    return %arg0, %c0_i32 : i32, i32
  }
  func.func @transform_1(%arg0: i32) -> (i32, i32) {
    %c0_i32 = arith.constant 0 : i32
    %c0_i32_0 = arith.constant 0 : i32
    %c0_i32_1 = arith.constant 0 : i32
    return %c0_i32, %c0_i32_0 : i32, i32
  }
  func.func @transform_2(%arg0: i32) -> (i32, i32) {
    %c0_i32 = arith.constant 0 : i32
    %c0_i32_0 = arith.constant 0 : i32
    %c0_i32_1 = arith.constant 0 : i32
    return %c0_i32, %c0_i32_0 : i32, i32
  }
  func.func @transform_3(%arg0: i32) -> (i32, i32) {
    %c0_i32 = arith.constant 0 : i32
    %c0_i32_0 = arith.constant 0 : i32
    %c0_i32_1 = arith.constant 0 : i32
    return %c0_i32, %c0_i32_0 : i32, i32
  }
  func.func @transform_4(%arg0: i32) -> (i32, i32) {
    %c0_i32 = arith.constant 0 : i32
    %c0_i32_0 = arith.constant 0 : i32
    %c0_i32_1 = arith.constant 0 : i32
    return %c0_i32, %c0_i32_0 : i32, i32
  }
  func.func @transform_5(%arg0: i32) -> (i32, i32) {
    %c0_i32 = arith.constant 0 : i32
    %c0_i32_0 = arith.constant 0 : i32
    return %arg0, %c0_i32 : i32, i32
  }
}

</mosaic_0001>

<bundles_post_ra>
// kernel: tpu_custom_call.1
= control target key start
LH: loop header
LB: loop body
LE: loop exit
PB: predicated region body
PF: predicated region fallthrough
CT: control target
= control target key end

     0   :  { %10 = vsyncpa [#allocation3], 0  ;;  %s971_s0 = inlined_call_operand.vmem [shape: f32[128,4], index: 0, kind: input, shape index: {}]   ;;  %s972_s1 = inlined_call_operand.hbm [shape: bf16[4,128], index: 1, kind: input, shape index: {}]   ;;  %s973_s2 = inlined_call_operand.vmem [shape: bf16[128,128], index: 2, kind: input, shape index: {}]   ;;  %s974_s3 = inlined_call_operand.vmem [shape: bf16[128,128], index: 3, kind: input, shape index: {}]   ;;  %s975_s4 = inlined_call_operand.vmem [shape: f32[3,128], index: 4, kind: input, shape index: {}]   ;;  %s976_s5 = inlined_call_operand.hbm [shape: f32[128,128], index: 5, kind: output, shape index: {}]  }
   0x1   :  { %11 = vsyncpa [#allocation4], 0  ;;  %s818_s18 = smov [#allocation2]  }
   0x2   :  { %s20_s19 = sshll.u32 %s818_s18, 4  ;;  %s21_s19 = int_to_ptr.vmem [resolvable:$true] %s20_s19 }
   0x3   :  { %s782_s20 = scalar_lea.vmem %s21_s19, 32  ;;  %p787_p1 = scmp.lt.s32.totalorder %s21_s19, %s21_s19 }
   0x4   :  { %p783_p0 = scmp.ne.s32.totalorder %s21_s19, %s782_s20  ;;  %p788_p2 = scmp.lt.s32.totalorder %s782_s20, %s782_s20 }
   0x6   :  { %p789_p3 = por %p788_p2, %p787_p1 }
   0x8   :  { %p790_p4 = pnand %p789_p3, %p783_p0 }
   0xa   :  { %793 = shalt.err (!%p790_p4)
}
   0xb   :  { %23 = dma.hbm_to_vmem [thread:$0]  %s972_s1, 32, %s21_s19, [#allocation3]  }
   0xc   :  { %814 = dma.done.wait [#allocation3], 32  }
   0xd   :  { %815 = vsyncadd [#allocation3], 4294967264  ;;  %vm89_vm0 = vcmask 1041408   ;;  %v58_v0 = vld [vmem:[#allocation2] sm:$0x3]  ;;  %v35_v2 = vld [vmem:[%s971_s0 + $0x8] sm:$0xff] }
   0xe   :  { %v34_v1 = vld [vmem:[%s971_s0] sm:$0xff]  ;;  %vm64_vm1 = vcmask 31744   ;;  %753 = vmatprep.subr.msk.bf16.mxu0 %vm89_vm0, %v58_v0  ;;  %v91_v3 = vsel %vm89_vm0, %v58_v0, 0  ;;  %v36_v5 = vld [vmem:[%s971_s0 + $0x10] sm:$0xff]  ;;  %v37_v6 = vld [vmem:[%s971_s0 + $0x18] sm:$0xff] }
   0xf   :  { %v50_v4 = vpack.c.bf16 %v35_v2, %v34_v1  ;;  %v38_v7 = vld [vmem:[%s971_s0 + $0x20] sm:$0xff]  ;;  %672 = vmatpush3.bf16.msra.mxu0 %v91_v3  ;;  %v51_v8 = vpack.c.bf16 %v37_v6, %v36_v5  ;;  %v39_v9 = vld [vmem:[%s971_s0 + $0x28] sm:$0xff]  ;;  %v40_v11 = vld [vmem:[%s971_s0 + $0x30] sm:$0xff] }
  0x10   :  { %v52_v10 = vpack.c.bf16 %v39_v9, %v38_v7  ;;  %v41_v12 = vld [vmem:[%s971_s0 + $0x38] sm:$0xff]  ;;  %v42_v13 = vld [vmem:[%s971_s0 + $0x40] sm:$0xff]  ;;  %v43_v14 = vld [vmem:[%s971_s0 + $0x48] sm:$0xff] }
  0x11   :  { %673 = vmatprep.mubr.msk.bf16.mxu0 %vm64_vm1, %v50_v4  ;;  %v758_v15 = vld [vmem:[%s973_s2 + $0x38] sm:$0xff]   ;;  %v759_v16 = vld [vmem:[%s973_s2 + $0x30] sm:$0xff]   ;;  %v53_v17 = vpack.c.bf16 %v41_v12, %v40_v11  ;;  %v54_v18 = vpack.c.bf16 %v43_v14, %v42_v13  ;;  %v760_v19 = vld [vmem:[%s973_s2 + $0x28] sm:$0xff]  }
  0x12   :  { %674 = vmatmul.mubr.msk.bf16.vlgmr.msra.gmra.mxu0 %vm64_vm1, %v51_v8  ;;  %689 = vmatprep.subr.bf16.mxu1 %v758_v15  ;;  %v44_v20 = vld [vmem:[%s971_s0 + $0x50] sm:$0xff]  ;;  %v45_v21 = vld [vmem:[%s971_s0 + $0x58] sm:$0xff]  ;;  %v761_v22 = vld [vmem:[%s973_s2 + $0x20] sm:$0xff]  }
  0x13   :  { %677 = vmatprep.mubr.msk.bf16.mxu0 %vm64_vm1, %v52_v10  ;;  %690 = vmatpush3.bf16.msra.mxu1 %v758_v15  ;;  %v46_v23 = vld [vmem:[%s971_s0 + $0x60] sm:$0xff]  ;;  %v47_v24 = vld [vmem:[%s971_s0 + $0x68] sm:$0xff]  ;;  %v55_v25 = vpack.c.bf16 %v45_v21, %v44_v20  ;;  %v762_v27 = vld [vmem:[%s973_s2 + $0x18] sm:$0xff]  }
  0x14   :  { %691 = vmatprep.subr.bf16.mxu1 %v759_v16  ;;  %v56_v26 = vpack.c.bf16 %v47_v24, %v46_v23  ;;  %v48_v28 = vld [vmem:[%s971_s0 + $0x70] sm:$0xff]  ;;  %v49_v29 = vld [vmem:[%s971_s0 + $0x78] sm:$0xff]  ;;  %v764_v32 = vld [vmem:[%s973_s2 + $0x8] sm:$0xff]  }
  0x15   :  { %v57_v30 = vpack.c.bf16 %v49_v29, %v48_v28  ;;  %v763_v31 = vld [vmem:[%s973_s2 + $0x10] sm:$0xff]   ;;  %v765_v33 = vld [vmem:[%s973_s2] sm:$0xff]   ;;  %v766_v34 = vld [vmem:[%s974_s3 + $0x38] sm:$0xff]  }
  0x16   :  { %v767_v35 = vld [vmem:[%s974_s3 + $0x30] sm:$0xff]   ;;  %721 = vmatprep.subr.bf16.mxu0 %v766_v34  ;;  %v768_v36 = vld [vmem:[%s974_s3 + $0x28] sm:$0xff]   ;;  %v769_v37 = vld [vmem:[%s974_s3 + $0x20] sm:$0xff]  }
  0x17   :  { %692 = vmatpush3.bf16.msra.mxu1 %v759_v16  ;;  %722 = vmatpush3.bf16.msra.mxu0 %v766_v34  ;;  %v770_v38 = vld [vmem:[%s974_s3 + $0x18] sm:$0xff]   ;;  %v603_v41 = vld [vmem:[%s975_s4] ss:$0 sm:$0xff] }
  0x18   :  { %693 = vmatprep.subr.bf16.mxu1 %v760_v19  ;;  %723 = vmatprep.subr.bf16.mxu0 %v767_v35  ;;  %v773_v34 = vld [vmem:[%s974_s3] sm:$0xff]  }
  0x1a   :  { %678 = vmatmul.mubr.msk.bf16.gmra.mxu0 %vm64_vm1, %v53_v17 }
  0x1b   :  { %681 = vmatprep.mubr.msk.bf16.mxu0 %vm64_vm1, %v54_v18  ;;  %694 = vmatpush3.bf16.msra.mxu1 %v760_v19 }
  0x1c   :  { %695 = vmatprep.subr.bf16.mxu1 %v761_v22  ;;  %724 = vmatpush3.bf16.msra.mxu0 %v767_v35 }
  0x1d   :  { %725 = vmatprep.subr.bf16.mxu0 %v768_v36 }
  0x1f   :  { %696 = vmatpush3.bf16.msra.mxu1 %v761_v22 }
  0x20   :  { %697 = vmatprep.subr.bf16.mxu1 %v762_v27  ;;  %726 = vmatpush3.bf16.msra.mxu0 %v768_v36 }
  0x21   :  { %727 = vmatprep.subr.bf16.mxu0 %v769_v37 }
  0x22   :  { %682 = vmatmul.mubr.msk.bf16.gmra.mxu0 %vm64_vm1, %v55_v25 }
  0x23   :  { %685 = vmatprep.mubr.msk.bf16.mxu0 %vm64_vm1, %v56_v26  ;;  %698 = vmatpush3.bf16.msra.mxu1 %v762_v27 }
  0x24   :  { %699 = vmatprep.subr.bf16.mxu1 %v763_v31  ;;  %728 = vmatpush3.bf16.msra.mxu0 %v769_v37  ;;  %v612_v37 = vld [vmem:[%s975_s4 + $0x1] ss:$0 sm:$0xff] }
  0x25   :  { %729 = vmatprep.subr.bf16.mxu0 %v770_v38 }
  0x27   :  { %700 = vmatpush3.bf16.msra.mxu1 %v763_v31 }
  0x28   :  { %701 = vmatprep.subr.bf16.mxu1 %v764_v32  ;;  %730 = vmatpush3.bf16.msra.mxu0 %v770_v38 }
  0x2a   :  { %686 = vmatmul.mubr.msk.bf16.gmra.mxu0 %vm64_vm1, %v57_v30 }
  0x2b   :  { %702 = vmatpush3.bf16.msra.mxu1 %v764_v32  ;;  %v771_v32 = vld [vmem:[%s974_s3 + $0x10] sm:$0xff]  }
  0x2c   :  { %703 = vmatprep.subr.bf16.mxu1 %v765_v33  ;;  %731 = vmatprep.subr.bf16.mxu0 %v771_v32 }
  0x2d   :  { %732 = vmatpush3.bf16.msra.mxu0 %v771_v32 }
  0x2f   :  { %704 = vmatpush3.bf16.msra.mxu1 %v765_v33  ;;  %v772_v33 = vld [vmem:[%s974_s3 + $0x8] sm:$0xff]  }
  0x30   :  { %733 = vmatprep.subr.bf16.mxu0 %v772_v33 }
  0x31   :  { %734 = vmatpush3.bf16.msra.mxu0 %v772_v33 }
  0x32   :  { %735 = vmatprep.subr.bf16.mxu0 %v773_v34 }
  0x35   :  { %736 = vmatpush3.bf16.msra.mxu0 %v773_v34 }
  0xd2   :  { %v675_v39 = vpop.f32.mrf.mxu0 }
  0xd3   :  { %v136_v45 = vadd.f32 %v675_v39, %v603_v41 }
  0xd4   :  { %v127_v40 = vpop.f32.mrf.mxu0 }
  0xd5   :  { %v128_v43 = vadd.f32 %v603_v41, %v127_v40  ;;  %v192_v52 = vmax.f32 %v136_v45, 0.0 }
  0xd6   :  { %v676_v42 = vpop.f32.mrf.mxu0 }
  0xd7   :  { %v139_v44 = vadd.f32 %v676_v42, %v603_v41  ;;  %v190_v50 = vmax.f32 %v128_v43, 0.0 }
  0xd8   :  { %v130_v46 = vpop.f32.mrf.mxu0 }
  0xd9   :  { %v131_v47 = vadd.f32 %v603_v41, %v130_v46  ;;  %v193_v48 = vmax.f32 %v139_v44, 0.0 }
  0xda   :  { %v679_v49 = vpop.f32.mrf.mxu0 }
  0xdb   :  { %v191_v51 = vmax.f32 %v131_v47, 0.0  ;;  %v207_v55 = vpack.c.bf16 %v193_v48, %v192_v52  ;;  %v152_v59 = vadd.f32 %v679_v49, %v603_v41 }
  0xdc   :  { %v143_v53 = vpop.f32.mrf.mxu0 }
  0xdd   :  { %v206_v54 = vpack.c.bf16 %v191_v51, %v190_v50  ;;  %v144_v57 = vadd.f32 %v603_v41, %v143_v53  ;;  %v196_v2 = vmax.f32 %v152_v59, 0.0 }
  0xde   :  { %v680_v56 = vpop.f32.mrf.mxu0 }
  0xdf   :  { %v155_v58 = vadd.f32 %v680_v56, %v603_v41  ;;  %705 = vmatprep.mubr.bf16.mxu1 %v206_v54  ;;  %v194_v0 = vmax.f32 %v144_v57, 0.0 }
  0xe0   :  { %v146_v60 = vpop.f32.mrf.mxu0  ;;  %706 = vmatmul.mubr.bf16.vlgmr.msra.gmra.mxu1 %v207_v55 }
  0xe1   :  { %v147_v61 = vadd.f32 %v603_v41, %v146_v60  ;;  %v197_v62 = vmax.f32 %v155_v58, 0.0 }
  0xe2   :  { %v683_v63 = vpop.f32.mrf.mxu0 }
  0xe3   :  { %v195_v1 = vmax.f32 %v147_v61, 0.0  ;;  %v209_v5 = vpack.c.bf16 %v197_v62, %v196_v2  ;;  %v168_v9 = vadd.f32 %v683_v63, %v603_v41 }
  0xe4   :  { %v159_v3 = vpop.f32.mrf.mxu0 }
  0xe5   :  { %v208_v4 = vpack.c.bf16 %v195_v1, %v194_v0  ;;  %v160_v7 = vadd.f32 %v603_v41, %v159_v3  ;;  %v200_v16 = vmax.f32 %v168_v9, 0.0 }
  0xe6   :  { %v684_v6 = vpop.f32.mrf.mxu0 }
  0xe7   :  { %v171_v8 = vadd.f32 %v684_v6, %v603_v41  ;;  %709 = vmatprep.mubr.bf16.mxu1 %v208_v4  ;;  %v198_v14 = vmax.f32 %v160_v7, 0.0 }
  0xe8   :  { %v162_v10 = vpop.f32.mrf.mxu0  ;;  %710 = vmatmul.mubr.bf16.gmra.mxu1 %v209_v5 }
  0xe9   :  { %v163_v11 = vadd.f32 %v603_v41, %v162_v10  ;;  %v201_v12 = vmax.f32 %v171_v8, 0.0 }
  0xea   :  { %v687_v13 = vpop.f32.mrf.mxu0 }
  0xeb   :  { %v199_v15 = vmax.f32 %v163_v11, 0.0  ;;  %v211_v19 = vpack.c.bf16 %v201_v12, %v200_v16  ;;  %v184_v23 = vadd.f32 %v687_v13, %v603_v41 }
  0xec   :  { %v175_v17 = vpop.f32.mrf.mxu0 }
  0xed   :  { %v210_v18 = vpack.c.bf16 %v199_v15, %v198_v14  ;;  %v176_v21 = vadd.f32 %v603_v41, %v175_v17  ;;  %v204_v29 = vmax.f32 %v184_v23, 0.0 }
  0xee   :  { %v688_v20 = vpop.f32.mrf.mxu0 }
  0xef   :  { %v187_v22 = vadd.f32 %v688_v20, %v603_v41  ;;  %713 = vmatprep.mubr.bf16.mxu1 %v210_v18  ;;  %v202_v27 = vmax.f32 %v176_v21, 0.0 }
  0xf0   :  { %v178_v24 = vpop.f32.mrf.mxu0  ;;  %714 = vmatmul.mubr.bf16.gmra.mxu1 %v211_v19 }
  0xf1   :  { %v179_v25 = vadd.f32 %v603_v41, %v178_v24  ;;  %v205_v26 = vmax.f32 %v187_v22, 0.0 }
  0xf3   :  { %v203_v28 = vmax.f32 %v179_v25, 0.0  ;;  %v213_v31 = vpack.c.bf16 %v205_v26, %v204_v29 }
  0xf5   :  { %v212_v30 = vpack.c.bf16 %v203_v28, %v202_v27  ;;  %v621_v28 = vld [vmem:[%s975_s4 + $0x2] ss:$0 sm:$0xff]  ;;  %s819_s4 = smov [#allocation5]  }
  0xf6   :  { %s591_s12 = sshll.u32 %s819_s4, 4  ;;  %s592_s12 = int_to_ptr.vmem [resolvable:$true] %s591_s12 }
  0xf7   :  { %717 = vmatprep.mubr.bf16.mxu1 %v212_v30  ;;  %s794_s13 = scalar_lea.vmem %s592_s12, 2048  ;;  %p799_p6 = scmp.lt.s32.totalorder %s592_s12, %s592_s12 }
  0xf8   :  { %718 = vmatmul.mubr.bf16.gmra.mxu1 %v213_v31  ;;  %p795_p5 = scmp.ne.s32.totalorder %s592_s12, %s794_s13  ;;  %p800_p7 = scmp.lt.s32.totalorder %s794_s13, %s794_s13 }
  0xfa   :  { %p801_p8 = por %p800_p7, %p799_p6 }
  0xfc   :  { %p802_p9 = pnand %p801_p8, %p795_p5 }
 0x1a0   :  { %v707_v35 = vpop.f32.mrf.mxu1 }
 0x1a1   :  { %v326_v41 = vadd.f32 %v707_v35, %v612_v37 }
 0x1a2   :  { %v317_v36 = vpop.f32.mrf.mxu1 }
 0x1a3   :  { %v318_v39 = vadd.f32 %v612_v37, %v317_v36  ;;  %v382_v48 = vmax.f32 %v326_v41, 0.0 }
 0x1a4   :  { %v708_v38 = vpop.f32.mrf.mxu1 }
 0x1a5   :  { %v329_v40 = vadd.f32 %v708_v38, %v612_v37  ;;  %v380_v46 = vmax.f32 %v318_v39, 0.0 }
 0x1a6   :  { %v320_v42 = vpop.f32.mrf.mxu1 }
 0x1a7   :  { %v321_v43 = vadd.f32 %v612_v37, %v320_v42  ;;  %v383_v44 = vmax.f32 %v329_v40, 0.0 }
 0x1a8   :  { %v711_v45 = vpop.f32.mrf.mxu1 }
 0x1a9   :  { %v381_v47 = vmax.f32 %v321_v43, 0.0  ;;  %v397_v51 = vpack.c.bf16 %v383_v44, %v382_v48  ;;  %v342_v55 = vadd.f32 %v711_v45, %v612_v37 }
 0x1aa   :  { %v333_v49 = vpop.f32.mrf.mxu1 }
 0x1ab   :  { %v396_v50 = vpack.c.bf16 %v381_v47, %v380_v46  ;;  %v334_v53 = vadd.f32 %v612_v37, %v333_v49  ;;  %v386_v62 = vmax.f32 %v342_v55, 0.0 }
 0x1ac   :  { %v712_v52 = vpop.f32.mrf.mxu1 }
 0x1ad   :  { %v345_v54 = vadd.f32 %v712_v52, %v612_v37  ;;  %737 = vmatprep.mubr.bf16.mxu0 %v396_v50  ;;  %v384_v60 = vmax.f32 %v334_v53, 0.0 }
 0x1ae   :  { %v336_v56 = vpop.f32.mrf.mxu1  ;;  %738 = vmatmul.mubr.bf16.vlgmr.msra.gmra.mxu0 %v397_v51 }
 0x1af   :  { %v337_v57 = vadd.f32 %v612_v37, %v336_v56  ;;  %v387_v58 = vmax.f32 %v345_v54, 0.0 }
 0x1b0   :  { %v715_v59 = vpop.f32.mrf.mxu1 }
 0x1b1   :  { %v385_v61 = vmax.f32 %v337_v57, 0.0  ;;  %v399_v1 = vpack.c.bf16 %v387_v58, %v386_v62  ;;  %v358_v5 = vadd.f32 %v715_v59, %v612_v37 }
 0x1b2   :  { %v349_v63 = vpop.f32.mrf.mxu1 }
 0x1b3   :  { %v398_v0 = vpack.c.bf16 %v385_v61, %v384_v60  ;;  %v350_v3 = vadd.f32 %v612_v37, %v349_v63  ;;  %v390_v12 = vmax.f32 %v358_v5, 0.0 }
 0x1b4   :  { %v716_v2 = vpop.f32.mrf.mxu1 }
 0x1b5   :  { %v361_v4 = vadd.f32 %v716_v2, %v612_v37  ;;  %741 = vmatprep.mubr.bf16.mxu0 %v398_v0  ;;  %v388_v10 = vmax.f32 %v350_v3, 0.0 }
 0x1b6   :  { %v352_v6 = vpop.f32.mrf.mxu1  ;;  %742 = vmatmul.mubr.bf16.gmra.mxu0 %v399_v1 }
 0x1b7   :  { %v353_v7 = vadd.f32 %v612_v37, %v352_v6  ;;  %v391_v8 = vmax.f32 %v361_v4, 0.0 }
 0x1b8   :  { %v719_v9 = vpop.f32.mrf.mxu1 }
 0x1b9   :  { %v389_v11 = vmax.f32 %v353_v7, 0.0  ;;  %v401_v15 = vpack.c.bf16 %v391_v8, %v390_v12  ;;  %v374_v19 = vadd.f32 %v719_v9, %v612_v37 }
 0x1ba   :  { %v365_v13 = vpop.f32.mrf.mxu1 }
 0x1bb   :  { %v400_v14 = vpack.c.bf16 %v389_v11, %v388_v10  ;;  %v366_v17 = vadd.f32 %v612_v37, %v365_v13  ;;  %v394_v25 = vmax.f32 %v374_v19, 0.0 }
 0x1bc   :  { %v720_v16 = vpop.f32.mrf.mxu1 }
 0x1bd   :  { %v377_v18 = vadd.f32 %v720_v16, %v612_v37  ;;  %745 = vmatprep.mubr.bf16.mxu0 %v400_v14  ;;  %v392_v23 = vmax.f32 %v366_v17, 0.0 }
 0x1be   :  { %v368_v20 = vpop.f32.mrf.mxu1  ;;  %746 = vmatmul.mubr.bf16.gmra.mxu0 %v401_v15 }
 0x1bf   :  { %v369_v21 = vadd.f32 %v612_v37, %v368_v20  ;;  %v395_v22 = vmax.f32 %v377_v18, 0.0 }
 0x1c1   :  { %v393_v24 = vmax.f32 %v369_v21, 0.0  ;;  %v403_v27 = vpack.c.bf16 %v395_v22, %v394_v25 }
 0x1c3   :  { %v402_v26 = vpack.c.bf16 %v393_v24, %v392_v23 }
 0x1c5   :  { %749 = vmatprep.mubr.bf16.mxu0 %v402_v26 }
 0x1c6   :  { %750 = vmatmul.mubr.bf16.gmra.mxu0 %v403_v27 }
 0x26e   :  { %v739_v29 = vpop.f32.mrf.mxu0 }
 0x26f   :  { %v516_v30 = vadd.f32 %v739_v29, %v621_v28 }
 0x270   :  { %v507_v31 = vpop.f32.mrf.mxu0 }
 0x271   :  { %572 = vst [vmem:[#allocation5 + $0x10] sm:$0xff] %v516_v30  ;;  %v508_v32 = vadd.f32 %v621_v28, %v507_v31 }
 0x272   :  { %v740_v33 = vpop.f32.mrf.mxu0 }
 0x273   :  { %570 = vst [vmem:[#allocation5] sm:$0xff] %v508_v32  ;;  %v519_v34 = vadd.f32 %v740_v33, %v621_v28 }
 0x274   :  { %v510_v35 = vpop.f32.mrf.mxu0 }
 0x275   :  { %573 = vst [vmem:[#allocation5 + $0x18] sm:$0xff] %v519_v34  ;;  %v511_v36 = vadd.f32 %v621_v28, %v510_v35 }
 0x276   :  { %v743_v37 = vpop.f32.mrf.mxu0 }
 0x277   :  { %571 = vst [vmem:[#allocation5 + $0x8] sm:$0xff] %v511_v36  ;;  %v532_v38 = vadd.f32 %v743_v37, %v621_v28 }
 0x278   :  { %v523_v39 = vpop.f32.mrf.mxu0 }
 0x279   :  { %576 = vst [vmem:[#allocation5 + $0x30] sm:$0xff] %v532_v38  ;;  %v524_v40 = vadd.f32 %v621_v28, %v523_v39 }
 0x27a   :  { %v744_v41 = vpop.f32.mrf.mxu0 }
 0x27b   :  { %574 = vst [vmem:[#allocation5 + $0x20] sm:$0xff] %v524_v40  ;;  %v535_v42 = vadd.f32 %v744_v41, %v621_v28 }
 0x27c   :  { %v526_v43 = vpop.f32.mrf.mxu0 }
 0x27d   :  { %577 = vst [vmem:[#allocation5 + $0x38] sm:$0xff] %v535_v42  ;;  %v527_v44 = vadd.f32 %v621_v28, %v526_v43 }
 0x27e   :  { %v747_v45 = vpop.f32.mrf.mxu0 }
 0x27f   :  { %575 = vst [vmem:[#allocation5 + $0x28] sm:$0xff] %v527_v44  ;;  %v548_v46 = vadd.f32 %v747_v45, %v621_v28 }
 0x280   :  { %v539_v47 = vpop.f32.mrf.mxu0 }
 0x281   :  { %580 = vst [vmem:[#allocation5 + $0x50] sm:$0xff] %v548_v46  ;;  %v540_v48 = vadd.f32 %v621_v28, %v539_v47 }
 0x282   :  { %v748_v49 = vpop.f32.mrf.mxu0 }
 0x283   :  { %578 = vst [vmem:[#allocation5 + $0x40] sm:$0xff] %v540_v48  ;;  %v551_v50 = vadd.f32 %v748_v49, %v621_v28 }
 0x284   :  { %v542_v51 = vpop.f32.mrf.mxu0 }
 0x285   :  { %581 = vst [vmem:[#allocation5 + $0x58] sm:$0xff] %v551_v50  ;;  %v543_v52 = vadd.f32 %v621_v28, %v542_v51 }
 0x286   :  { %v751_v53 = vpop.f32.mrf.mxu0 }
 0x287   :  { %579 = vst [vmem:[#allocation5 + $0x48] sm:$0xff] %v543_v52  ;;  %v564_v54 = vadd.f32 %v751_v53, %v621_v28 }
 0x288   :  { %v555_v55 = vpop.f32.mrf.mxu0 }
 0x289   :  { %584 = vst [vmem:[#allocation5 + $0x70] sm:$0xff] %v564_v54  ;;  %v556_v56 = vadd.f32 %v621_v28, %v555_v55 }
 0x28a   :  { %v752_v57 = vpop.f32.mrf.mxu0 }
 0x28b   :  { %582 = vst [vmem:[#allocation5 + $0x60] sm:$0xff] %v556_v56  ;;  %v567_v58 = vadd.f32 %v752_v57, %v621_v28 }
 0x28c   :  { %v558_v59 = vpop.f32.mrf.mxu0 }
 0x28d   :  { %585 = vst [vmem:[#allocation5 + $0x78] sm:$0xff] %v567_v58  ;;  %v559_v60 = vadd.f32 %v621_v28, %v558_v59 }
 0x28f   :  { %583 = vst [vmem:[#allocation5 + $0x68] sm:$0xff] %v559_v60 }
 0x290   :  { %805 = shalt.err (!%p802_p9)
}
 0x291   :  { %s820_s14 = smov 128   ;;  %s821_s15 = smov 8  }
 0x292   :  { %597 = dma.vmem_to_hbm [thread:$0]  %s592_s12, 2048, %s976_s5, [#allocation4], %s820_s14, %s820_s14, %s821_s15  }
 0x293   :  { %816 = dma.done.wait [#allocation4], 2048  }
 0x294   :  { %817 = vsyncadd [#allocation4], 4294965248 }
 0x295   :  { %601 = vsyncpa [#allocation3], 1 }
 0x296   :  { %602 = vsyncpa [#allocation4], 1 }

</bundles_post_ra>
